<compile_context>
chip_gen: v5e
topology: v5e:2x2
jax: 0.10.0
libtpu: 0.0.40
codegen_flags: <defaults>
</compile_context>

<pallas_src>
import functools

import jax
import jax.numpy as jnp
import numpy as np
from jax import lax
from jax.experimental import pallas as pl
from jax.experimental.pallas import tpu as pltpu

_INV_SQRT2 = 0.7071067811865476


# -----------------------------------------------------------------------------
# Pallas kernel: one full transformer Block forward for a tile of Bt batch elements.
# -----------------------------------------------------------------------------
def _block_kernel(
    x_ref,      # (Bt, N, C)   activations
    g1_ref,     # (1, C)       norm1 gamma (f32)
    b1_ref,     # (1, C)       norm1 beta  (f32)
    wqkv_ref,   # (C, 3C)      fused qkv weight (matmul dtype; attn scale folded into q)
    wp_ref,     # (C, C)       proj weight (matmul dtype)
    bp_ref,     # (1, C)       proj bias (f32)
    g2_ref,     # (1, C)       norm2 gamma
    b2_ref,     # (1, C)       norm2 beta
    w1_ref,     # (C, H)       fc1 weight (matmul dtype)
    bb1_ref,    # (1, H)       fc1 bias (f32)
    w2_ref,     # (H, C)       fc2 weight (matmul dtype)
    bb2_ref,    # (1, C)       fc2 bias (f32)
    o_ref,      # (Bt, N, C)
    *,
    num_heads: int,
    eps: float,
    matmul_dtype,
):
    bt, N, C = x_ref.shape
    R = bt * N
    hd = C // num_heads
    G = bt * num_heads
    cdt = matmul_dtype
    f32 = jnp.float32

    # Flatten batch tile into one big row block for all dense matmuls (fills MXU M dim).
    x = x_ref[...].astype(f32).reshape(R, C)                     # (R, C)

    # ---------------- LayerNorm 1 (f32) ----------------
    mu = jnp.mean(x, axis=-1, keepdims=True)
    var = jnp.mean((x - mu) ** 2, axis=-1, keepdims=True)
    h = (x - mu) * lax.rsqrt(var + eps) * g1_ref[...] + b1_ref[...]   # (R, C)

    # ---------------- Fused QKV projection (single MXU matmul, N = 3C) ----------------
    qkv = jnp.dot(h.astype(cdt), wqkv_ref[...], preferred_element_type=f32)   # (R, 3C)

    # Head split: (R, C) -> (bt*nh, N, hd).  Pure layout shuffle (XLU), overlaps with MXU.
    def split_heads(t_f32):
        t = t_f32.reshape(bt, N, num_heads, hd)
        t = jnp.transpose(t, (0, 2, 1, 3)).reshape(G, N, hd)
        return t.astype(cdt)

    q = split_heads(qkv[:, :C])          # scale already folded into Wq
    k = split_heads(qkv[:, C:2 * C])
    v = split_heads(qkv[:, 2 * C:])

    # ---------------- Attention core (softmax in f32) ----------------
    s = jnp.einsum('gnd,gmd->gnm', q, k, preferred_element_type=f32)    # (G, N, N)
    s = s - jnp.max(s, axis=-1, keepdims=True)
    p = jnp.exp(s)
    p = p * pl.reciprocal(jnp.sum(p, axis=-1, keepdims=True), approx=True)

    o = jnp.einsum('gnm,gmd->gnd', p.astype(cdt), v, preferred_element_type=f32)  # (G, N, hd)

    # Head repack: (bt*nh, N, hd) -> (R, C), then one (R,C)@(C,C) projection (K = C).
    o = jnp.transpose(o.reshape(bt, num_heads, N, hd), (0, 2, 1, 3)).reshape(R, C)
    y = jnp.dot(o.astype(cdt), wp_ref[...], preferred_element_type=f32) + bp_ref[...]

    # residual 1 (drop_path identity in eval / drop_path = 0)
    x1 = x + y

    # ---------------- LayerNorm 2 (f32) ----------------
    mu2 = jnp.mean(x1, axis=-1, keepdims=True)
    var2 = jnp.mean((x1 - mu2) ** 2, axis=-1, keepdims=True)
    h2 = (x1 - mu2) * lax.rsqrt(var2 + eps) * g2_ref[...] + b2_ref[...]

    # ---------------- MLP (bf16 MXU operands, f32 elementwise) ----------------
    z = jnp.dot(h2.astype(cdt), w1_ref[...], preferred_element_type=f32) + bb1_ref[...]  # (R, H)
    z = 0.5 * z * (1.0 + lax.erf(z * _INV_SQRT2))          # exact (erf) GELU == nn.GELU default
    m = jnp.dot(z.astype(cdt), w2_ref[...], preferred_element_type=f32) + bb2_ref[...]   # (R, C)

    # residual 2
    o_ref[...] = (x1 + m).reshape(bt, N, C).astype(o_ref.dtype)


# -----------------------------------------------------------------------------
# Helpers
# -----------------------------------------------------------------------------
def _pick_batch_tile(B: int, N: int, target_rows: int = 256) -> int:
    """Largest divisor of B with bt*N close to target_rows; keeps >=2 grid steps
    when B >= 2 so both v7x TensorCores get work on the 'parallel' batch axis."""
    max_bt = B if B < 2 else max(1, B // 2)
    target = max(1, target_rows // max(N, 1))
    for cand in range(min(max_bt, target), 0, -1):
        if B % cand == 0:
            return cand
    return 1


def _const_spec(shape):
    """Constant-index BlockSpec; single-buffered (weights never change across grid)."""
    idx = lambda b: (0,) * len(shape)
    if hasattr(pl, "Buffered"):
        try:
            return pl.BlockSpec(shape, idx, pipeline_mode=pl.Buffered(1))
        except TypeError:
            pass
    return pl.BlockSpec(shape, idx)


def _vmem_limit_bytes(bt, N, C, H, num_heads, matmul_dtype, act_itemsize) -> int:
    cb = jnp.dtype(matmul_dtype).itemsize
    R = bt * N
    weights = (4 * C * C + 2 * C * H) * cb            # wqkv + wproj + fc1 + fc2 (single-buffered)
    biases = (6 * C + H) * 4
    io = 2 * 2 * bt * N * C * act_itemsize            # x + out tiles, double-buffered
    inter = (8 * R * C * 4                            # LN / residual / proj f32 temps
             + R * 3 * C * (4 + cb)                   # fused qkv (f32 + cast copy)
             + 3 * R * C * cb                         # q/k/v head-split copies
             + 2 * num_heads * bt * N * N * 4         # scores + probs (f32)
             + R * H * (2 * 4 + cb))                  # MLP hidden
    est = weights + 2 * biases + io + inter + (8 << 20)
    try:
        cap = int(pltpu.get_tpu_info().vmem_capacity_bytes) - (16 << 20)   # headroom for Mosaic scratch
    except Exception:
        cap = 48 << 20
    return int(min(max(est, 32 << 20), max(cap, 32 << 20)))


# -----------------------------------------------------------------------------
# One-time weight prep (hoisted out of the per-call path)
# -----------------------------------------------------------------------------
def prepare_block_params(params, *, num_heads, matmul_dtype=jnp.bfloat16):
    C = params["wqkv"].shape[0]
    hd = C // num_heads
    assert hd * num_heads == C
    scale = hd ** (-0.5)
    wqkv = params["wqkv"]                                             # (C, 3C) = [q | k | v]
    wqkv_scaled = jnp.concatenate([wqkv[:, :C] * scale, wqkv[:, C:]], axis=1)
    return {
        "g1": params["g1"], "b1": params["b1"],
        "wqkv": wqkv_scaled.astype(matmul_dtype),
        "wproj": params["wproj"].astype(matmul_dtype),
        "bproj": params["bproj"],
        "g2": params["g2"], "b2": params["b2"],
        "w1": params["w1"].astype(matmul_dtype),
        "bb1": params["bb1"],
        "w2": params["w2"].astype(matmul_dtype),
        "bb2": params["bb2"],
    }


# -----------------------------------------------------------------------------
# Wrapper
# -----------------------------------------------------------------------------
def block_forward(x, packed, *, num_heads, eps=1e-5,
                  matmul_dtype=jnp.bfloat16, block_batch=None):
    B, N, C = x.shape
    H = packed["w1"].shape[1]
    assert C % num_heads == 0

    bt = block_batch if block_batch is not None else _pick_batch_tile(B, N)
    assert B % bt == 0, "batch tile must divide batch"
    grid_b = B // bt

    kernel = functools.partial(_block_kernel, num_heads=num_heads, eps=eps,
                               matmul_dtype=matmul_dtype)

    return pl.pallas_call(
        kernel,
        out_shape=jax.ShapeDtypeStruct((B, N, C), x.dtype),
        grid_spec=pltpu.PrefetchScalarGridSpec(
            num_scalar_prefetch=0,
            grid=(grid_b,),
            in_specs=[
                pl.BlockSpec((bt, N, C), lambda b: (b, 0, 0)),   # x tile
                _const_spec((1, C)),                             # norm1 gamma
                _const_spec((1, C)),                             # norm1 beta
                _const_spec((C, 3 * C)),                         # fused qkv weight
                _const_spec((C, C)),                             # proj weight
                _const_spec((1, C)),                             # proj bias
                _const_spec((1, C)),                             # norm2 gamma
                _const_spec((1, C)),                             # norm2 beta
                _const_spec((C, H)),                             # fc1 weight
                _const_spec((1, H)),                             # fc1 bias
                _const_spec((H, C)),                             # fc2 weight
                _const_spec((1, C)),                             # fc2 bias
            ],
            out_specs=pl.BlockSpec((bt, N, C), lambda b: (b, 0, 0)),
        ),
        compiler_params=pltpu.CompilerParams(
            dimension_semantics=("parallel",),
            vmem_limit_bytes=_vmem_limit_bytes(bt, N, C, H, num_heads, matmul_dtype,
                                               x.dtype.itemsize),
        ),
    )(
        x,
        packed["g1"], packed["b1"],
        packed["wqkv"], packed["wproj"], packed["bproj"],
        packed["g2"], packed["b2"],
        packed["w1"], packed["bb1"], packed["w2"], packed["bb2"],
    )


# -----------------------------------------------------------------------------
# Pure-JAX reference (mirrors the PyTorch module semantics in eval mode, f32)
# -----------------------------------------------------------------------------
def block_reference(x, params, *, num_heads, eps=1e-5):
    B, N, C = x.shape
    hd = C // num_heads
    scale = hd ** (-0.5)

    def ln(v, g, b):
        mu = jnp.mean(v, axis=-1, keepdims=True)
        var = jnp.mean((v - mu) ** 2, axis=-1, keepdims=True)
        return (v - mu) / jnp.sqrt(var + eps) * g + b

    h = ln(x, params["g1"][0], params["b1"][0])
    qkv = h @ params["wqkv"]                                  # (B, N, 3C)
    qkv = qkv.reshape(B, N, 3, num_heads, hd).transpose(2, 0, 3, 1, 4)
    q, k, v = qkv[0], qkv[1], qkv[2]                          # (B, nh, N, hd)
    attn = jax.nn.softmax((q @ jnp.swapaxes(k, -2, -1)) * scale, axis=-1)
    y = (attn @ v).transpose(0, 2, 1, 3).reshape(B, N, C)
    y = y @ params["wproj"] + params["bproj"][0]
    x1 = x + y

    h2 = ln(x1, params["g2"][0], params["b2"][0])
    z = h2 @ params["w1"] + params["bb1"][0]
    z = 0.5 * z * (1.0 + lax.erf(z * _INV_SQRT2))
    m = z @ params["w2"] + params["bb2"][0]
    return x1 + m


# -----------------------------------------------------------------------------
# Main
# -----------------------------------------------------------------------------
if __name__ == "__main__":
    # Small shapes consistent with the module: (B, N, C) tokens.
    B, N, C = 2, 8, 32
    num_heads = 4
    mlp_ratio = 4.0
    H = int(C * mlp_ratio)

    key = jax.random.PRNGKey(0)
    keys = jax.random.split(key, 8)

    x = jax.random.normal(keys[0], (B, N, C), dtype=jnp.float32)

    std = 0.02
    params = {
        "g1":    jnp.ones((1, C), jnp.float32),
        "b1":    jnp.zeros((1, C), jnp.float32),
        # nn.Linear stores weight as (out, in); pre-transposed to (in, out) so the
        # kernel computes x @ W directly.  qkv_bias=False (module default).
        "wqkv":  std * jax.random.normal(keys[1], (C, 3 * C), jnp.float32),
        "wproj": std * jax.random.normal(keys[2], (C, C), jnp.float32),
        "bproj": std * jax.random.normal(keys[3], (1, C), jnp.float32),
        "g2":    jnp.ones((1, C), jnp.float32),
        "b2":    jnp.zeros((1, C), jnp.float32),
        "w1":    std * jax.random.normal(keys[4], (C, H), jnp.float32),
        "bb1":   std * jax.random.normal(keys[5], (1, H), jnp.float32),
        "w2":    std * jax.random.normal(keys[6], (H, C), jnp.float32),
        "bb2":   std * jax.random.normal(keys[7], (1, C), jnp.float32),
    }

    packed = prepare_block_params(params, num_heads=num_heads)   # one-time weight prep
    out = jax.block_until_ready(block_forward(x, packed, num_heads=num_heads))
    ref = jax.block_until_ready(block_reference(x, params, num_heads=num_heads))
    np.testing.assert_allclose(np.asarray(out), np.asarray(ref), rtol=1e-2, atol=1e-2)

    print("KERNEL_OK")
</pallas_src>

<mosaic_0001>
module attributes {stable_mosaic.version = 11 : i64} {
  func.func @_block_kernel(%arg0: i32, %arg1: memref<1x8x32xf32, #tpu.memory_space<vmem>>, %arg2: memref<1x32xf32, #tpu.memory_space<vmem>>, %arg3: memref<1x32xf32, #tpu.memory_space<vmem>>, %arg4: memref<32x96xbf16, #tpu.memory_space<vmem>>, %arg5: memref<32x32xbf16, #tpu.memory_space<vmem>>, %arg6: memref<1x32xf32, #tpu.memory_space<vmem>>, %arg7: memref<1x32xf32, #tpu.memory_space<vmem>>, %arg8: memref<1x32xf32, #tpu.memory_space<vmem>>, %arg9: memref<32x128xbf16, #tpu.memory_space<vmem>>, %arg10: memref<1x128xf32, #tpu.memory_space<vmem>>, %arg11: memref<128x32xbf16, #tpu.memory_space<vmem>>, %arg12: memref<1x32xf32, #tpu.memory_space<vmem>>, %arg13: memref<1x8x32xf32, #tpu.memory_space<vmem>>) attributes {dimension_semantics = [#tpu.dimension_semantics<parallel>], iteration_bounds = array<i64: 2>, scalar_prefetch = 0 : i64, scratch_operands = 0 : i64, tpu.core_type = #tpu.core_type<tc>, window_params = [{transform_indices = @transform_0, window_bounds = array<i64: 1, 8, 32>}, {pipeline_mode = #tpu.pipeline_mode<synchronous>, transform_indices = @transform_1, window_bounds = array<i64: 1, 32>}, {pipeline_mode = #tpu.pipeline_mode<synchronous>, transform_indices = @transform_2, window_bounds = array<i64: 1, 32>}, {pipeline_mode = #tpu.pipeline_mode<synchronous>, transform_indices = @transform_3, window_bounds = array<i64: 32, 96>}, {pipeline_mode = #tpu.pipeline_mode<synchronous>, transform_indices = @transform_4, window_bounds = array<i64: 32, 32>}, {pipeline_mode = #tpu.pipeline_mode<synchronous>, transform_indices = @transform_5, window_bounds = array<i64: 1, 32>}, {pipeline_mode = #tpu.pipeline_mode<synchronous>, transform_indices = @transform_6, window_bounds = array<i64: 1, 32>}, {pipeline_mode = #tpu.pipeline_mode<synchronous>, transform_indices = @transform_7, window_bounds = array<i64: 1, 32>}, {pipeline_mode = #tpu.pipeline_mode<synchronous>, transform_indices = @transform_8, window_bounds = array<i64: 32, 128>}, {pipeline_mode = #tpu.pipeline_mode<synchronous>, transform_indices = @transform_9, window_bounds = array<i64: 1, 128>}, {pipeline_mode = #tpu.pipeline_mode<synchronous>, transform_indices = @transform_10, window_bounds = array<i64: 128, 32>}, {pipeline_mode = #tpu.pipeline_mode<synchronous>, transform_indices = @transform_11, window_bounds = array<i64: 1, 32>}, {transform_indices = @transform_12, window_bounds = array<i64: 1, 8, 32>}]} {
    %c0 = arith.constant 0 : index
    %c0_0 = arith.constant 0 : index
    %c0_1 = arith.constant 0 : index
    %0 = vector.load %arg1[%c0, %c0_0, %c0_1] : memref<1x8x32xf32, #tpu.memory_space<vmem>>, vector<1x8x32xf32>
    %1 = vector.shape_cast %0 : vector<1x8x32xf32> to vector<8x32xf32>
    %cst = arith.constant dense<0.000000e+00> : vector<8xf32>
    %2 = vector.multi_reduction <add>, %1, %cst [1] : vector<8x32xf32> to vector<8xf32>
    %3 = vector.shape_cast %2 : vector<8xf32> to vector<8x1xf32>
    %cst_2 = arith.constant 3.200000e+01 : f32
    %4 = vector.broadcast %cst_2 : f32 to vector<8x1xf32>
    %5 = arith.divf %3, %4 : vector<8x1xf32>
    %6 = vector.broadcast %5 : vector<8x1xf32> to vector<8x32xf32>
    %7 = arith.subf %1, %6 : vector<8x32xf32>
    %8 = arith.mulf %7, %7 : vector<8x32xf32>
    %cst_3 = arith.constant dense<0.000000e+00> : vector<8xf32>
    %9 = vector.multi_reduction <add>, %8, %cst_3 [1] : vector<8x32xf32> to vector<8xf32>
    %10 = vector.shape_cast %9 : vector<8xf32> to vector<8x1xf32>
    %cst_4 = arith.constant 3.200000e+01 : f32
    %11 = vector.broadcast %cst_4 : f32 to vector<8x1xf32>
    %12 = arith.divf %10, %11 : vector<8x1xf32>
    %13 = vector.broadcast %5 : vector<8x1xf32> to vector<8x32xf32>
    %14 = arith.subf %1, %13 : vector<8x32xf32>
    %cst_5 = arith.constant 9.99999974E-6 : f32
    %15 = vector.broadcast %cst_5 : f32 to vector<8x1xf32>
    %16 = arith.addf %12, %15 : vector<8x1xf32>
    %17 = math.rsqrt %16 : vector<8x1xf32>
    %18 = vector.broadcast %17 : vector<8x1xf32> to vector<8x32xf32>
    %19 = arith.mulf %14, %18 : vector<8x32xf32>
    %c0_6 = arith.constant 0 : index
    %c0_7 = arith.constant 0 : index
    %20 = vector.load %arg2[%c0_6, %c0_7] : memref<1x32xf32, #tpu.memory_space<vmem>>, vector<1x32xf32>
    %21 = vector.broadcast %20 : vector<1x32xf32> to vector<8x32xf32>
    %22 = arith.mulf %19, %21 : vector<8x32xf32>
    %c0_8 = arith.constant 0 : index
    %c0_9 = arith.constant 0 : index
    %23 = vector.load %arg3[%c0_8, %c0_9] : memref<1x32xf32, #tpu.memory_space<vmem>>, vector<1x32xf32>
    %24 = vector.broadcast %23 : vector<1x32xf32> to vector<8x32xf32>
    %25 = arith.addf %22, %24 : vector<8x32xf32>
    %26 = arith.truncf %25 : vector<8x32xf32> to vector<8x32xbf16>
    %c0_10 = arith.constant 0 : index
    %c0_11 = arith.constant 0 : index
    %27 = vector.load %arg4[%c0_10, %c0_11] : memref<32x96xbf16, #tpu.memory_space<vmem>>, vector<32x96xbf16>
    %cst_12 = arith.constant dense<0.000000e+00> : vector<8x96xf32>
    %28 = tpu.matmul %26, %27, %cst_12 {dimension_numbers = #tpu.dot_dimension_numbers<[1], [0], [0], [1], [0, 0, 1, 1], [], []>} : vector<8x32xbf16>, vector<32x96xbf16>, vector<8x96xf32> -> vector<8x96xf32>
    %29 = vector.extract_strided_slice %28 {offsets = [0, 0], sizes = [8, 32], strides = [1, 1]} : vector<8x96xf32> to vector<8x32xf32>
    %30 = vector.shape_cast %29 : vector<8x32xf32> to vector<1x8x4x8xf32>
    %31 = tpu.transpose %30, [0, 2, 1, 3] : vector<1x8x4x8xf32> -> vector<1x4x8x8xf32>
    %32 = vector.shape_cast %31 : vector<1x4x8x8xf32> to vector<4x8x8xf32>
    %33 = arith.truncf %32 : vector<4x8x8xf32> to vector<4x8x8xbf16>
    %34 = vector.extract_strided_slice %28 {offsets = [0, 32], sizes = [8, 32], strides = [1, 1]} : vector<8x96xf32> to vector<8x32xf32>
    %35 = vector.shape_cast %34 : vector<8x32xf32> to vector<1x8x4x8xf32>
    %36 = tpu.transpose %35, [0, 2, 1, 3] : vector<1x8x4x8xf32> -> vector<1x4x8x8xf32>
    %37 = vector.shape_cast %36 : vector<1x4x8x8xf32> to vector<4x8x8xf32>
    %38 = arith.truncf %37 : vector<4x8x8xf32> to vector<4x8x8xbf16>
    %39 = vector.extract_strided_slice %28 {offsets = [0, 64], sizes = [8, 32], strides = [1, 1]} : vector<8x96xf32> to vector<8x32xf32>
    %40 = vector.shape_cast %39 : vector<8x32xf32> to vector<1x8x4x8xf32>
    %41 = tpu.transpose %40, [0, 2, 1, 3] : vector<1x8x4x8xf32> -> vector<1x4x8x8xf32>
    %42 = vector.shape_cast %41 : vector<1x4x8x8xf32> to vector<4x8x8xf32>
    %43 = arith.truncf %42 : vector<4x8x8xf32> to vector<4x8x8xbf16>
    "tpu.trace_start"() <{level = 10 : i32, message = "gnd,gmd->gnm"}> : () -> ()
    %cst_13 = arith.constant dense<0.000000e+00> : vector<4x8x8xf32>
    %44 = tpu.matmul %33, %38, %cst_13 {dimension_numbers = #tpu.dot_dimension_numbers<[2], [2], [1], [1], [0, 0, 0, 1, 1, 1], [0], [0]>} : vector<4x8x8xbf16>, vector<4x8x8xbf16>, vector<4x8x8xf32> -> vector<4x8x8xf32>
    "tpu.trace_stop"() : () -> ()
    %cst_14 = arith.constant dense<0xFF800000> : vector<4x8xf32>
    %45 = vector.multi_reduction <maximumf>, %44, %cst_14 [2] : vector<4x8x8xf32> to vector<4x8xf32>
    %46 = vector.shape_cast %45 : vector<4x8xf32> to vector<4x8x1xf32>
    %47 = vector.broadcast %46 : vector<4x8x1xf32> to vector<4x8x8xf32>
    %48 = arith.subf %44, %47 : vector<4x8x8xf32>
    %49 = math.exp %48 : vector<4x8x8xf32>
    %cst_15 = arith.constant dense<0.000000e+00> : vector<4x8xf32>
    %50 = vector.multi_reduction <add>, %49, %cst_15 [2] : vector<4x8x8xf32> to vector<4x8xf32>
    %51 = vector.shape_cast %50 : vector<4x8xf32> to vector<4x8x1xf32>
    %52 = tpu.reciprocal %51 {approx = true} : vector<4x8x1xf32> -> vector<4x8x1xf32>
    %53 = vector.broadcast %52 : vector<4x8x1xf32> to vector<4x8x8xf32>
    %54 = arith.mulf %49, %53 : vector<4x8x8xf32>
    %55 = arith.truncf %54 : vector<4x8x8xf32> to vector<4x8x8xbf16>
    "tpu.trace_start"() <{level = 10 : i32, message = "gnm,gmd->gnd"}> : () -> ()
    %cst_16 = arith.constant dense<0.000000e+00> : vector<4x8x8xf32>
    %56 = tpu.matmul %55, %43, %cst_16 {dimension_numbers = #tpu.dot_dimension_numbers<[2], [1], [1], [2], [0, 0, 0, 1, 1, 2], [0], [0]>} : vector<4x8x8xbf16>, vector<4x8x8xbf16>, vector<4x8x8xf32> -> vector<4x8x8xf32>
    "tpu.trace_stop"() : () -> ()
    %57 = vector.shape_cast %56 : vector<4x8x8xf32> to vector<1x4x8x8xf32>
    %58 = tpu.transpose %57, [0, 2, 1, 3] : vector<1x4x8x8xf32> -> vector<1x8x4x8xf32>
    %59 = vector.shape_cast %58 : vector<1x8x4x8xf32> to vector<8x32xf32>
    %60 = arith.truncf %59 : vector<8x32xf32> to vector<8x32xbf16>
    %c0_17 = arith.constant 0 : index
    %c0_18 = arith.constant 0 : index
    %61 = vector.load %arg5[%c0_17, %c0_18] : memref<32x32xbf16, #tpu.memory_space<vmem>>, vector<32x32xbf16>
    %cst_19 = arith.constant dense<0.000000e+00> : vector<8x32xf32>
    %62 = tpu.matmul %60, %61, %cst_19 {dimension_numbers = #tpu.dot_dimension_numbers<[1], [0], [0], [1], [0, 0, 1, 1], [], []>} : vector<8x32xbf16>, vector<32x32xbf16>, vector<8x32xf32> -> vector<8x32xf32>
    %c0_20 = arith.constant 0 : index
    %c0_21 = arith.constant 0 : index
    %63 = vector.load %arg6[%c0_20, %c0_21] : memref<1x32xf32, #tpu.memory_space<vmem>>, vector<1x32xf32>
    %64 = vector.broadcast %63 : vector<1x32xf32> to vector<8x32xf32>
    %65 = arith.addf %62, %64 : vector<8x32xf32>
    %66 = arith.addf %1, %65 : vector<8x32xf32>
    %cst_22 = arith.constant dense<0.000000e+00> : vector<8xf32>
    %67 = vector.multi_reduction <add>, %66, %cst_22 [1] : vector<8x32xf32> to vector<8xf32>
    %68 = vector.shape_cast %67 : vector<8xf32> to vector<8x1xf32>
    %cst_23 = arith.constant 3.200000e+01 : f32
    %69 = vector.broadcast %cst_23 : f32 to vector<8x1xf32>
    %70 = arith.divf %68, %69 : vector<8x1xf32>
    %71 = vector.broadcast %70 : vector<8x1xf32> to vector<8x32xf32>
    %72 = arith.subf %66, %71 : vector<8x32xf32>
    %73 = arith.mulf %72, %72 : vector<8x32xf32>
    %cst_24 = arith.constant dense<0.000000e+00> : vector<8xf32>
    %74 = vector.multi_reduction <add>, %73, %cst_24 [1] : vector<8x32xf32> to vector<8xf32>
    %75 = vector.shape_cast %74 : vector<8xf32> to vector<8x1xf32>
    %cst_25 = arith.constant 3.200000e+01 : f32
    %76 = vector.broadcast %cst_25 : f32 to vector<8x1xf32>
    %77 = arith.divf %75, %76 : vector<8x1xf32>
    %78 = vector.broadcast %70 : vector<8x1xf32> to vector<8x32xf32>
    %79 = arith.subf %66, %78 : vector<8x32xf32>
    %cst_26 = arith.constant 9.99999974E-6 : f32
    %80 = vector.broadcast %cst_26 : f32 to vector<8x1xf32>
    %81 = arith.addf %77, %80 : vector<8x1xf32>
    %82 = math.rsqrt %81 : vector<8x1xf32>
    %83 = vector.broadcast %82 : vector<8x1xf32> to vector<8x32xf32>
    %84 = arith.mulf %79, %83 : vector<8x32xf32>
    %c0_27 = arith.constant 0 : index
    %c0_28 = arith.constant 0 : index
    %85 = vector.load %arg7[%c0_27, %c0_28] : memref<1x32xf32, #tpu.memory_space<vmem>>, vector<1x32xf32>
    %86 = vector.broadcast %85 : vector<1x32xf32> to vector<8x32xf32>
    %87 = arith.mulf %84, %86 : vector<8x32xf32>
    %c0_29 = arith.constant 0 : index
    %c0_30 = arith.constant 0 : index
    %88 = vector.load %arg8[%c0_29, %c0_30] : memref<1x32xf32, #tpu.memory_space<vmem>>, vector<1x32xf32>
    %89 = vector.broadcast %88 : vector<1x32xf32> to vector<8x32xf32>
    %90 = arith.addf %87, %89 : vector<8x32xf32>
    %91 = arith.truncf %90 : vector<8x32xf32> to vector<8x32xbf16>
    %c0_31 = arith.constant 0 : index
    %c0_32 = arith.constant 0 : index
    %92 = vector.load %arg9[%c0_31, %c0_32] : memref<32x128xbf16, #tpu.memory_space<vmem>>, vector<32x128xbf16>
    %cst_33 = arith.constant dense<0.000000e+00> : vector<8x128xf32>
    %93 = tpu.matmul %91, %92, %cst_33 {dimension_numbers = #tpu.dot_dimension_numbers<[1], [0], [0], [1], [0, 0, 1, 1], [], []>} : vector<8x32xbf16>, vector<32x128xbf16>, vector<8x128xf32> -> vector<8x128xf32>
    %c0_34 = arith.constant 0 : index
    %c0_35 = arith.constant 0 : index
    %94 = vector.load %arg10[%c0_34, %c0_35] : memref<1x128xf32, #tpu.memory_space<vmem>>, vector<1x128xf32>
    %95 = vector.broadcast %94 : vector<1x128xf32> to vector<8x128xf32>
    %96 = arith.addf %93, %95 : vector<8x128xf32>
    %cst_36 = arith.constant 5.000000e-01 : f32
    %97 = vector.broadcast %cst_36 : f32 to vector<8x128xf32>
    %98 = arith.mulf %97, %96 : vector<8x128xf32>
    %cst_37 = arith.constant 0.707106769 : f32
    %99 = vector.broadcast %cst_37 : f32 to vector<8x128xf32>
    %100 = arith.mulf %96, %99 : vector<8x128xf32>
    %101 = math.erf %100 : vector<8x128xf32>
    %cst_38 = arith.constant 1.000000e+00 : f32
    %102 = vector.broadcast %cst_38 : f32 to vector<8x128xf32>
    %103 = arith.addf %102, %101 : vector<8x128xf32>
    %104 = arith.mulf %98, %103 : vector<8x128xf32>
    %105 = arith.truncf %104 : vector<8x128xf32> to vector<8x128xbf16>
    %c0_39 = arith.constant 0 : index
    %c0_40 = arith.constant 0 : index
    %106 = vector.load %arg11[%c0_39, %c0_40] : memref<128x32xbf16, #tpu.memory_space<vmem>>, vector<128x32xbf16>
    %cst_41 = arith.constant dense<0.000000e+00> : vector<8x32xf32>
    %107 = tpu.matmul %105, %106, %cst_41 {dimension_numbers = #tpu.dot_dimension_numbers<[1], [0], [0], [1], [0, 0, 1, 1], [], []>} : vector<8x128xbf16>, vector<128x32xbf16>, vector<8x32xf32> -> vector<8x32xf32>
    %c0_42 = arith.constant 0 : index
    %c0_43 = arith.constant 0 : index
    %108 = vector.load %arg12[%c0_42, %c0_43] : memref<1x32xf32, #tpu.memory_space<vmem>>, vector<1x32xf32>
    %109 = vector.broadcast %108 : vector<1x32xf32> to vector<8x32xf32>
    %110 = arith.addf %107, %109 : vector<8x32xf32>
    %111 = arith.addf %66, %110 : vector<8x32xf32>
    %112 = vector.shape_cast %111 : vector<8x32xf32> to vector<1x8x32xf32>
    %c0_44 = arith.constant 0 : index
    %c0_45 = arith.constant 0 : index
    %c0_46 = arith.constant 0 : index
    %113 = vector.load %arg13[%c0_44, %c0_45, %c0_46] : memref<1x8x32xf32, #tpu.memory_space<vmem>>, vector<1x8x32xf32>
    tpu.vector_store %arg13[%c0_44, %c0_45, %c0_46], %112 {strides = array<i32>} : memref<1x8x32xf32, #tpu.memory_space<vmem>>, vector<1x8x32xf32>,
    return
  }
  func.func @transform_0(%arg0: i32) -> (i32, i32, i32) {
    %c0_i32 = arith.constant 0 : i32
    %c0_i32_0 = arith.constant 0 : i32
    %c0_i32_1 = arith.constant 0 : i32
    return %arg0, %c0_i32, %c0_i32_0 : i32, i32, i32
  }
  func.func @transform_1(%arg0: i32) -> (i32, i32) {
    %c0_i32 = arith.constant 0 : i32
    %c0_i32_0 = arith.constant 0 : i32
    %c0_i32_1 = arith.constant 0 : i32
    return %c0_i32, %c0_i32_0 : i32, i32
  }
  func.func @transform_2(%arg0: i32) -> (i32, i32) {
    %c0_i32 = arith.constant 0 : i32
    %c0_i32_0 = arith.constant 0 : i32
    %c0_i32_1 = arith.constant 0 : i32
    return %c0_i32, %c0_i32_0 : i32, i32
  }
  func.func @transform_3(%arg0: i32) -> (i32, i32) {
    %c0_i32 = arith.constant 0 : i32
    %c0_i32_0 = arith.constant 0 : i32
    %c0_i32_1 = arith.constant 0 : i32
    return %c0_i32, %c0_i32_0 : i32, i32
  }
  func.func @transform_4(%arg0: i32) -> (i32, i32) {
    %c0_i32 = arith.constant 0 : i32
    %c0_i32_0 = arith.constant 0 : i32
    %c0_i32_1 = arith.constant 0 : i32
    return %c0_i32, %c0_i32_0 : i32, i32
  }
  func.func @transform_5(%arg0: i32) -> (i32, i32) {
    %c0_i32 = arith.constant 0 : i32
    %c0_i32_0 = arith.constant 0 : i32
    %c0_i32_1 = arith.constant 0 : i32
    return %c0_i32, %c0_i32_0 : i32, i32
  }
  func.func @transform_6(%arg0: i32) -> (i32, i32) {
    %c0_i32 = arith.constant 0 : i32
    %c0_i32_0 = arith.constant 0 : i32
    %c0_i32_1 = arith.constant 0 : i32
    return %c0_i32, %c0_i32_0 : i32, i32
  }
  func.func @transform_7(%arg0: i32) -> (i32, i32) {
    %c0_i32 = arith.constant 0 : i32
    %c0_i32_0 = arith.constant 0 : i32
    %c0_i32_1 = arith.constant 0 : i32
    return %c0_i32, %c0_i32_0 : i32, i32
  }
  func.func @transform_8(%arg0: i32) -> (i32, i32) {
    %c0_i32 = arith.constant 0 : i32
    %c0_i32_0 = arith.constant 0 : i32
    %c0_i32_1 = arith.constant 0 : i32
    return %c0_i32, %c0_i32_0 : i32, i32
  }
  func.func @transform_9(%arg0: i32) -> (i32, i32) {
    %c0_i32 = arith.constant 0 : i32
    %c0_i32_0 = arith.constant 0 : i32
    %c0_i32_1 = arith.constant 0 : i32
    return %c0_i32, %c0_i32_0 : i32, i32
  }
  func.func @transform_10(%arg0: i32) -> (i32, i32) {
    %c0_i32 = arith.constant 0 : i32
    %c0_i32_0 = arith.constant 0 : i32
    %c0_i32_1 = arith.constant 0 : i32
    return %c0_i32, %c0_i32_0 : i32, i32
  }
  func.func @transform_11(%arg0: i32) -> (i32, i32) {
    %c0_i32 = arith.constant 0 : i32
    %c0_i32_0 = arith.constant 0 : i32
    %c0_i32_1 = arith.constant 0 : i32
    return %c0_i32, %c0_i32_0 : i32, i32
  }
  func.func @transform_12(%arg0: i32) -> (i32, i32, i32) {
    %c0_i32 = arith.constant 0 : i32
    %c0_i32_0 = arith.constant 0 : i32
    %c0_i32_1 = arith.constant 0 : i32
    return %arg0, %c0_i32, %c0_i32_0 : i32, i32, i32
  }
}

</mosaic_0001>

<bundles_post_ra>
// kernel: tpu_custom_call.1
= control target key start
LH: loop header
LB: loop body
LE: loop exit
PB: predicated region body
PF: predicated region fallthrough
CT: control target
= control target key end

     0   :  { %s2218_s0 = inlined_call_operand.vmem [shape: f32[2,8,32], index: 0, kind: input, shape index: {}]   ;;  %s2219_s1 = inlined_call_operand.vmem [shape: f32[1,32], index: 1, kind: input, shape index: {}]   ;;  %s2220_s2 = inlined_call_operand.vmem [shape: f32[1,32], index: 2, kind: input, shape index: {}]   ;;  %s2221_s3 = inlined_call_operand.vmem [shape: bf16[32,96], index: 3, kind: input, shape index: {}]   ;;  %s2222_s4 = inlined_call_operand.vmem [shape: bf16[32,32], index: 4, kind: input, shape index: {}]   ;;  %s2223_s5 = inlined_call_operand.vmem [shape: f32[1,32], index: 5, kind: input, shape index: {}]   ;;  %s2224_s6 = inlined_call_operand.vmem [shape: f32[1,32], index: 6, kind: input, shape index: {}]   ;;  %s2225_s7 = inlined_call_operand.vmem [shape: f32[1,32], index: 7, kind: input, shape index: {}]   ;;  %s2226_s8 = inlined_call_operand.vmem [shape: bf16[32,128], index: 8, kind: input, shape index: {}]   ;;  %s2227_s9 = inlined_call_operand.vmem [shape: f32[1,128], index: 9, kind: input, shape index: {}]   ;;  %s2228_s10 = inlined_call_operand.vmem [shape: bf16[128,32], index: 10, kind: input, shape index: {}]   ;;  %s2229_s11 = inlined_call_operand.vmem [shape: f32[1,32], index: 11, kind: input, shape index: {}]   ;;  %s2230_s12 = inlined_call_operand.hbm [shape: f32[2,8,32], index: 12, kind: output, shape index: {}]  }
   0x1   :  { %2231 = sst [smem:[#allocation5_spill]] %s2218_s0 }
   0x2   :  { %2232 = sst [smem:[#allocation6_spill]] %s2219_s1 }
   0x3   :  { %2233 = sst [smem:[#allocation7_spill]] %s2220_s2 }
   0x4   :  { %17 = vsyncpa [#allocation3], 0 }
   0x5   :  { %19 = vsyncpa [#allocation3 + $0x1], 0  ;;  %s1833_s21 = smov 0   ;;  %s1835_s22 = smov 0  }
   0x6   :  { %s1837_s23 = smov 0   ;;  %s1839_s24 = smov 0  }
   0x7 LB: > { %s1854_s25 = sadd.s32 4294967295, %s1755_s24   ;;  %s1500_s26 = sadd.s32 4294967294, %s1755_s24   ;;  %s1755_s24 = sphi %s1839_s24, %s2242_s24   ;;  %s1751_s23 = sphi %s1837_s23, %s2241_s23   ;;  %s1747_s22 = sphi %s1835_s22, %s2240_s22   ;;  %s1743_s21 = sphi %s1833_s21, %s2239_s21  }
   0x8   : > { %s1858_s27 = sadd.s32 1, %s1755_s24   ;;  %s289_s28 = sadd.s32 1, %s1751_s23 }
   0x9   : > { %s286_s29 = ssub.s32 %s1755_s24, %s1858_s27  ;;  %p299_p0 = scmp.ne.s32.totalorder %s1751_s23, %s1747_s22 }
   0xa   : > { %p287_p1 = scmp.eq.s32.totalorder %s286_s29, 0  ;;  %p300_p2 = scmp.eq.s32.totalorder %s1854_s25, 1 }
   0xb   : > { %p305_p3 = scmp.ne.s32.totalorder %s1747_s22, %s1743_s21  ;;  %p306_p4 = scmp.eq.s32.totalorder %s1500_s26, 1 }
   0xc   : > { %s1869_s30 = scalar_select %p287_p1, %s1751_s23, %s289_s28  }
   0xd   : > { %p1871_p5 = por %p300_p2, %p299_p0  ;;  %p1875_p6 = por %p306_p4, %p305_p3 }
   0xe   : > { %p1503_p7 = scmp.ge.s32.totalorder %s1755_s24, 1  ;;  %p364_p8 = scmp.lt.s32.totalorder %s1755_s24, 3 }
  0x10   : > { %p365_p9 = pnand %p1503_p7, %p364_p8 }
  0x11   : > { %p405_p10 = scmp.lt.s32.totalorder (!%p365_p9), %s1854_s25, 1  ;;  %s2236_s0 = sld [smem:[#allocation5_spill]] (!%p365_p9) }
  0x12   : > { %368 = sbr.rel (%p365_p9) target bundleno = 2105 (0x839), region = 68  ;;  %s2237_s1 = sld [smem:[#allocation6_spill]] (!%p365_p9) }
  0x13   : > { %s2238_s2 = sld [smem:[#allocation7_spill]] (!%p365_p9)  ;;  %s1759_s20 = smov (!%p365_p9), 120  }
  0x14   : > { %s1760_s26 = smov (!%p365_p9), 112   ;;  %s1761_s28 = smov (!%p365_p9), 96  }
  0x15   : > { %s1764_s29 = smov (!%p365_p9), 64   ;;  %s1767_s17 = smov (!%p365_p9), 24  }
  0x17   : > { %s406_s15 = scalar_select %p405_p10, %s1854_s25, 1  ;;  %vm411_vm0 = vcmask 261120   ;;  %v1757_v2 = vmov 32.0   ;;  %v1579_v14 = vld [vmem:[%s2221_s3 + $0x8] sm:$0xff]  ;;  %v1578_v15 = vld [vmem:[%s2221_s3] sm:$0xff]  ;;  %vm495_vm5 = vcmask 1047556  }
  0x18   : > { %1669 = vrcp.f32 %v1757_v2  ;;  %477 = vmatpush.bf16.msra.mxu0 %v1579_v14  ;;  %v1662_v25 = vld [vmem:[%s2237_s1] ss:$0 sm:$0xff]  ;;  %v1762_v40 = vmov 1983009808   ;;  %v1763_v54 = vmov 1934713408  }
  0x19   : > { %s1505_s16 = sshll.u32 %s406_s15, 3  ;;  %v1663_v28 = vld [vmem:[%s2238_s2] ss:$0 sm:$0xff]  ;;  %v500_v41 = vunpack.c.l.s4 %v1762_v40  ;;  %v524_v55 = vunpack.c.l.s4 %v1763_v54  ;;  %vm861_vm6 = vcmask 64512   ;;  %vm989_vm7 = vcmask 1043456   ;;  %s1765_s15 = smov 8  }
  0x1a   : > { %s408_s19 = scalar_lea.vmem %s2236_s0, %s1505_s16  ;;  %s1766_s16 = smov 16   ;;  %vm1186_vm8 = vcmask 130048   ;;  %vm1188_vm9 = vcmask 195584  }
  0x1b   : > { %v1886_v0 = vld [vmem:[%s408_s19] sm:$0xff]  ;;  %s1758_s19 = smov 104   ;;  %v1917_v45 = vunpack.c.0.s8 %v500_v41  ;;  %v1927_v60 = vunpack.c.0.s8 %v524_v55 }
  0x1c   : > { %v412_v1 = vsel %vm411_vm0, %v1886_v0, 0.0  ;;  %478 = vmatpush.bf16.msra.mxu0 %v1578_v15 }
  0x1d   : > { %413 = vadd.xlane.f32.xlu0 %v412_v1 }
  0x1e   : > { %v1670_v3 = vpop.eup %1669 }
  0x1f   : > { %v416_v4 = vmul.f32 32.0, %v1670_v3  ;;  %vm420_vm1 = vweird.f32 %v1670_v3 }
  0x21   : > { %v417_v5 = vsub.f32 1.0, %v416_v4 }
  0x23   : > { %v418_v6 = vmul.f32 %v1670_v3, %v417_v5 }
  0x25   : > { %v419_v7 = vadd.f32 %v1670_v3, %v418_v6 }
  0x27   : > { %v1890_v8 = vsel %vm420_vm1, %v1670_v3, %v419_v7 }
  0x90   : > { %v414_v9 = vpop.xlane.xlu0 %413 }
  0x91   : > { %v422_v10 = vmul.f32 %v1890_v8, %v414_v9 }
  0x93   : > { %v423_v11 = vsub.f32 %v1886_v0, %v422_v10 }
  0x95   : > { %v424_v12 = vmul.f32 %v423_v11, %v423_v11 }
  0x97   : > { %v425_v13 = vsel %vm411_vm0, %v424_v12, 0.0 }
  0x98   : > { %426 = vadd.xlane.f32.xlu0 %v425_v13 }
 0x10b   : > { %v427_v16 = vpop.xlane.xlu0 %426 }
 0x10c   : > { %v428_v17 = vmul.f32 %v427_v16, %v1890_v8 }
 0x10e   : > { %v429_v18 = vadd.f32 1e-05, %v428_v17 }
 0x110   : > { %1671 = vrsqrt.f32 %v429_v18  ;;  %vm436_vm3 = vweird.f32 %v429_v18 }
 0x116   : > { %v1672_v19 = vpop.eup %1671 }
 0x117   : > { %v431_v20 = vmul.f32 %v1672_v19, %v429_v18  ;;  %vm437_vm2 = vweird.f32 %v1672_v19 }
 0x118   : > { %vm438_vm4 = vmor %vm436_vm3, %vm437_vm2 }
 0x119   : > { %v432_v21 = vmul.f32 %v1672_v19, %v431_v20 }
 0x11b   : > { %v433_v22 = vmul.f32 0.5, %v432_v21 }
 0x11d   : > { %v434_v23 = vsub.f32 1.5, %v433_v22 }
 0x11f   : > { %v435_v24 = vmul.f32 %v1672_v19, %v434_v23 }
 0x121   : > { %v439_v26 = vsel %vm438_vm4, %v1672_v19, %v435_v24 }
 0x122   : > { %v440_v27 = vmul.f32 %v439_v26, %v423_v11 }
 0x124   : > { %v445_v29 = vmul.f32 %v1662_v25, %v440_v27 }
 0x126   : > { %v450_v30 = vadd.f32 %v1663_v28, %v445_v29 }
 0x128   : > { %v451_v31 = vpack.c.bf16 %v450_v30, %v450_v30 }
 0x12a   : > { %1514 = vmatmul.msk.bf16.vlgmr.msra.gmra.mxu0 %vm411_vm0, %v451_v31 }
 0x1a7   : > { %v480_v32 = vpop.f32.mrf.mxu0 }
 0x1a8   : > { %491 = vrot.lane.b32.xlu2 %v480_v32, %s1758_s19  ;;  %485 = vrot.lane.b32.xlu1 %v480_v32, %s1759_s20  ;;  %v497_v42 = vrot.slane %v480_v32, 4 }
 0x1af   : > { %v482_v33 = vpop.f32.mrf.mxu0 }
 0x1b0   : > { %488 = vrot.lane.b32.xlu1 %v480_v32, %s1760_s26 }
 0x202   : > { %v492_v36 = vpop.permute.xlu2 %491 }
 0x203   : > { %v507_v49 = vrot.slane %v492_v36, 4 }
 0x21a   : > { %v486_v34 = vpop.permute.xlu1 %485 }
 0x21b   : > { %v1909_v35 = vpack.i.bf16 %v486_v34, %v480_v32  ;;  %v509_v46 = vrot.slane %v486_v34, 4  ;;  %v508_v50 = vsel %vm495_vm5, %v507_v49, %v486_v34 }
 0x21c   : > { %v514_v56 = vperm.slane %v508_v50, %v1917_v45 }
 0x21d   : > { %1643 = vrot.lane.b32.xlu2 %v1909_v35, %s1761_s28  ;;  %v510_v51 = vsel %vm495_vm5, %v492_v36, %v509_v46 }
 0x21e   : > { %v518_v57 = vperm.slane %v510_v51, %v1917_v45  ;;  %v519_v61 = vrot.slane %v514_v56, 4 }
 0x220   : > { %v531_v62 = vrot.slane %v518_v57, 4 }
 0x222   : > { %v489_v37 = vpop.permute.xlu1 %488 }
 0x223   : > { %v1912_v38 = vpack.i.bf16 %v492_v36, %v489_v37  ;;  %v494_v39 = vrot.slane %v489_v37, 4  ;;  %v498_v44 = vsel %vm495_vm5, %v489_v37, %v497_v42 }
 0x224   : > { %v506_v48 = vperm.slane %v498_v44, %v1917_v45 }
 0x225   : > { %1648 = vrot.lane.b32.xlu0 %v1912_v38, %s1761_s28  ;;  %v496_v43 = vsel %vm495_vm5, %v494_v39, %v480_v32 }
 0x226   : > { %v502_v47 = vperm.slane %v496_v43, %v1917_v45  ;;  %v533_v53 = vrot.slane %v506_v48, 4  ;;  %v532_v4 = vsel %vm495_vm5, %v531_v62, %v506_v48 }
 0x227   : > { %v538_v9 = vperm.slane %v532_v4, %v1927_v60 }
 0x228   : > { %v521_v52 = vrot.slane %v502_v47, 4  ;;  %v534_v59 = vsel %vm495_vm5, %v518_v57, %v533_v53  ;;  %v520_v3 = vsel %vm495_vm5, %v519_v61, %v502_v47 }
 0x229   : > { %v542_v1 = vperm.slane %v534_v59, %v1927_v60  ;;  %v526_v7 = vperm.slane %v520_v3, %v1927_v60  ;;  %v547_v18 = vrot.slane %v538_v9, 4 }
 0x22a   : > { %v522_v58 = vsel %vm495_vm5, %v514_v56, %v521_v52 }
 0x22b   : > { %v530_v63 = vperm.slane %v522_v58, %v1927_v60  ;;  %v549_v11 = vrot.slane %v542_v1, 4  ;;  %v543_v17 = vrot.slane %v526_v7, 4  ;;  %v548_v37 = vsel %vm495_vm5, 0.0, %v547_v18 }
 0x22d   : > { %v545_v10 = vrot.slane %v530_v63, 4  ;;  %v550_v19 = vsel %vm495_vm5, 0.0, %v549_v11  ;;  %v562_v25 = vsel %vm495_vm5, %v549_v11, %v538_v9  ;;  %v544_v39 = vsel %vm495_vm5, 0.0, %v543_v17 }
 0x22e   : > { %v567_v28 = vrot.slane %v550_v19, 4  ;;  %v566_v46 = vperm.slane %v562_v25, %v1917_v45 }
 0x22f   : > { %v546_v20 = vsel %vm495_vm5, 0.0, %v545_v10  ;;  %v551_v40 = vsel %vm495_vm5, %v545_v10, %v526_v7 }
 0x230   : > { %v556_v31 = vrot.slane %v546_v20, 4  ;;  %v568_v49 = vsel %vm495_vm5, %v567_v28, %v548_v37  ;;  %v555_v52 = vperm.slane %v551_v40, %v1917_v45  ;;  %v587_v63 = vrot.slane %v566_v46, 4 }
 0x231   : > { %v572_v58 = vperm.slane %v568_v49, %v1917_v45 }
 0x232   : > { %v557_v53 = vsel %vm495_vm5, %v556_v31, %v544_v39  ;;  %v575_v4 = vrot.slane %v555_v52, 4 }
 0x233   : > { %v561_v3 = vperm.slane %v557_v53, %v1917_v45  ;;  %v588_v20 = vsel %vm495_vm5, %v572_v58, %v587_v63 }
 0x235   : > { %v576_v19 = vsel %vm495_vm5, %v561_v3, %v575_v4 }
 0x277   : > { %v1644_v2 = vpop.permute.xlu2 %1643 }
 0x278   : > { %v1646_v5 = vunpack.i.h.bf16 %v1644_v2  ;;  %v1645_v6 = vunpack.i.l.bf16 %v1644_v2 }
 0x27a   : > { %v635_v13 = vrot.slane %v1646_v5, 4  ;;  %v623_v14 = vrot.slane %v1645_v6, 4 }
 0x297   : > { %v1649_v12 = vpop.permute.xlu0 %1648 }
 0x298   : > { %v1651_v15 = vunpack.i.h.bf16 %v1649_v12  ;;  %v1650_v16 = vunpack.i.l.bf16 %v1649_v12 }
 0x29a   : > { %v633_v21 = vrot.slane %v1651_v15, 4  ;;  %v636_v22 = vsel %vm495_vm5, %v1651_v15, %v635_v13  ;;  %v621_v23 = vrot.slane %v1650_v16, 4  ;;  %v624_v24 = vsel %vm495_vm5, %v1650_v16, %v623_v14 }
 0x29b   : > { %v644_v26 = vperm.slane %v636_v22, %v1917_v45  ;;  %v632_v27 = vperm.slane %v624_v24, %v1917_v45  ;;  %v585_v13 = vrot.slane %v572_v58, 4  ;;  %v573_v24 = vrot.slane %v561_v3, 4 }
 0x29c   : > { %v634_v29 = vsel %vm495_vm5, %v633_v21, %v1646_v5  ;;  %v622_v30 = vsel %vm495_vm5, %v621_v23, %v1645_v6 }
 0x29d   : > { %v640_v32 = vperm.slane %v634_v29, %v1917_v45  ;;  %v657_v33 = vrot.slane %v644_v26, 4  ;;  %v628_v34 = vperm.slane %v622_v30, %v1917_v45  ;;  %v659_v36 = vrot.slane %v632_v27, 4 }
 0x29e   : > { %v596_v30 = vperm.slane %v588_v20, %v1927_v60  ;;  %v574_v37 = vsel %vm495_vm5, %v573_v24, %v555_v52 }
 0x29f   : > { %v645_v41 = vrot.slane %v640_v32, 4  ;;  %v647_v42 = vrot.slane %v628_v34, 4  ;;  %v658_v43 = vsel %vm495_vm5, %v657_v33, %v632_v27  ;;  %v660_v44 = vsel %vm495_vm5, %v644_v26, %v659_v36 }
 0x2a0   : > { %v664_v47 = vperm.slane %v658_v43, %v1927_v60  ;;  %v668_v48 = vperm.slane %v660_v44, %v1927_v60  ;;  %v586_v26 = vsel %vm495_vm5, %v585_v13, %v566_v46  ;;  %v601_v46 = vrot.slane %v596_v30, 4 }
 0x2a1   : > { %v646_v50 = vsel %vm495_vm5, %v645_v41, %v628_v34  ;;  %v648_v51 = vsel %vm495_vm5, %v640_v32, %v647_v42  ;;  %v584_v34 = vperm.slane %v576_v19, %v1927_v60  ;;  %v592_v39 = vperm.slane %v586_v26, %v1927_v60 }
 0x2a2   : > { %v652_v54 = vperm.slane %v646_v50, %v1927_v60  ;;  %v656_v55 = vperm.slane %v648_v51, %v1927_v60  ;;  %v673_v56 = vrot.slane %v664_v47, 4  ;;  %v675_v57 = vrot.slane %v668_v48, 4 }
 0x2a3   : > { %v580_v50 = vperm.slane %v574_v37, %v1927_v60 }
 0x2a4   : > { %v669_v59 = vrot.slane %v652_v54, 4  ;;  %v671_v61 = vrot.slane %v656_v55, 4  ;;  %v676_v62 = vsel %vm495_vm5, 0.0, %v675_v57  ;;  %v688_v2 = vsel %vm495_vm5, %v675_v57, %v664_v47 }
 0x2a5   : > { %v693_v1 = vrot.slane %v676_v62, 4  ;;  %v674_v6 = vsel %vm495_vm5, 0.0, %v673_v56  ;;  %v692_v9 = vperm.slane %v688_v2, %v1917_v45  ;;  %v603_v55 = vrot.slane %v584_v34, 4 }
 0x2a6   : > { %v672_v5 = vsel %vm495_vm5, 0.0, %v671_v61  ;;  %v677_v7 = vsel %vm495_vm5, %v671_v61, %v652_v54  ;;  %v670_v14 = vsel %vm495_vm5, 0.0, %v669_v59  ;;  %v597_v56 = vrot.slane %v592_v39, 4 }
 0x2a7   : > { %v681_v10 = vperm.slane %v677_v7, %v1917_v45  ;;  %v682_v11 = vrot.slane %v672_v5, 4  ;;  %v694_v12 = vsel %vm495_vm5, %v693_v1, %v674_v6  ;;  %v713_v16 = vrot.slane %v692_v9, 4 }
 0x2a8   : > { %v698_v15 = vperm.slane %v694_v12, %v1917_v45  ;;  %v602_v61 = vsel %vm495_vm5, %v601_v46, %v584_v34  ;;  %v599_v62 = vrot.slane %v580_v50, 4  ;;  %v598_v1 = vsel %vm495_vm5, %v597_v56, %v580_v50 }
 0x2a9   : > { %v683_v17 = vsel %vm495_vm5, %v682_v11, %v670_v14  ;;  %v701_v18 = vrot.slane %v681_v10, 4  ;;  %v604_v2 = vsel %vm495_vm5, %v596_v30, %v603_v55  ;;  %v607_v3 = vpack.c.bf16 %v602_v61, %v602_v61 }
 0x2aa   : > { %v687_v21 = vperm.slane %v683_v17, %v1917_v45  ;;  %v714_v22 = vsel %vm495_vm5, %v698_v15, %v713_v16  ;;  %v711_v23 = vrot.slane %v698_v15, 4  ;;  %v600_v4 = vsel %vm495_vm5, %v592_v39, %v599_v62 }
 0x2ab   : > { %v722_v25 = vperm.slane %v714_v22, %v1927_v60  ;;  %v605_v5 = vpack.c.bf16 %v598_v1, %v598_v1  ;;  %v608_v6 = vpack.c.bf16 %v604_v2, %v604_v2  ;;  %v606_v7 = vpack.c.bf16 %v600_v4, %v600_v4 }
 0x2ac   : > { %v702_v27 = vsel %vm495_vm5, %v687_v21, %v701_v18  ;;  %v699_v28 = vrot.slane %v687_v21, 4  ;;  %v712_v29 = vsel %vm495_vm5, %v711_v23, %v692_v9 }
 0x2ad   : > { %v710_v31 = vperm.slane %v702_v27, %v1927_v60  ;;  %v727_v32 = vrot.slane %v722_v25, 4  ;;  %v718_v33 = vperm.slane %v712_v29, %v1927_v60 }
 0x2ae   : > { %v700_v36 = vsel %vm495_vm5, %v699_v28, %v681_v10 }
 0x2af   : > { %v728_v40 = vsel %vm495_vm5, %v727_v32, %v710_v31  ;;  %v706_v41 = vperm.slane %v700_v36, %v1927_v60  ;;  %v723_v42 = vrot.slane %v718_v33, 4  ;;  %v729_v43 = vrot.slane %v710_v31, 4 }
 0x2b0   : > { %v733_v44 = vpack.c.bf16 %v728_v40, %v728_v40 }
 0x2b1   : > { %v724_v47 = vsel %vm495_vm5, %v723_v42, %v706_v41  ;;  %v730_v48 = vsel %vm495_vm5, %v722_v25, %v729_v43  ;;  %v725_v49 = vrot.slane %v706_v41, 4 }
 0x2b2   : > { %v904_v51 = vsel %vm861_vm6, %v733_v44, 0  ;;  %v731_v52 = vpack.c.bf16 %v724_v47, %v724_v47  ;;  %v734_v53 = vpack.c.bf16 %v730_v48, %v730_v48 }
 0x2b3   : > { %913 = vmatpush.bf16.xpose.msra.mxu3 %v904_v51  ;;  %v726_v54 = vsel %vm495_vm5, %v718_v33, %v725_v49 }
 0x2b4   : > { %v866_v57 = vsel %vm861_vm6, %v731_v52, 0  ;;  %v923_v58 = vsel %vm861_vm6, %v734_v53, 0  ;;  %v732_v59 = vpack.c.bf16 %v726_v54, %v726_v54 }
 0x2b5   : > { %875 = vmatpush.bf16.xpose.msra.mxu1 %v866_v57  ;;  %932 = vmatpush.bf16.xpose.msrb.mxu0 %v923_v58 }
 0x2b6   : > { %v885_v63 = vsel %vm861_vm6, %v732_v59, 0 }
 0x2b7   : > { %894 = vmatpush.bf16.xpose.msra.mxu2 %v885_v63 }
 0x2ba   : > { %1517 = vmatmul.msk.bf16.vlgmr.msra.gmra.mxu3 %vm861_vm6, %v607_v3 }
 0x2bc   : > { %1515 = vmatmul.msk.bf16.vlgmr.msra.gmra.mxu1 %vm861_vm6, %v605_v5  ;;  %1518 = vmatmul.msk.bf16.vlgmr.msrb.gmra.mxu0 %vm861_vm6, %v608_v6 }
 0x2be   : > { %1516 = vmatmul.msk.bf16.vlgmr.msra.gmra.mxu2 %vm861_vm6, %v606_v7 }
 0x339   : > { %v877_v9 = vpop.f32.mrf.mxu1  ;;  %v934_v10 = vpop.f32.mrf.mxu0 }
 0x33a   : > { %v938_v11 = vsel %vm861_vm6, %v877_v9, -inf  ;;  %v947_v12 = vsel %vm861_vm6, %v934_v10, -inf }
 0x33b   : > { %939 = vmax.xlane.f32.xlu0 %v938_v11  ;;  %948 = vmax.xlane.f32.xlu2 %v947_v12 }
 0x33d   : > { %v915_v13 = vpop.f32.mrf.mxu3 }
 0x33e   : > { %v944_v14 = vsel %vm861_vm6, %v915_v13, -inf }
 0x33f   : > { %945 = vmax.xlane.f32.xlu1 %v944_v14 }
 0x341   : > { %v879_v15 = vpop.f32.mrf.mxu1  ;;  %v896_v16 = vpop.f32.mrf.mxu2 }
 0x342   : > { %v936_v17 = vpop.f32.mrf.mxu0  ;;  %v941_v18 = vsel %vm861_vm6, %v896_v16, -inf }
 0x343   : > { %942 = vmax.xlane.f32.xlu2 %v941_v18 }
 0x345   : > { %v917_v19 = vpop.f32.mrf.mxu3 }
 0x349   : > { %v898_v20 = vpop.f32.mrf.mxu2 }
 0x358   : > { %1653 = vrot.lane.b32.xlu1 %v1909_v35, %s1764_s29 }
 0x35b   : > { %1658 = vrot.lane.b32.xlu2 %v1912_v38, %s1764_s29  ;;  %s402_s29 = sand.u32 1, %s1747_s22  }
 0x3ae   : > { %v949_v21 = vpop.xlane.xlu2 %948  ;;  %v940_v24 = vpop.xlane.xlu0 %939 }
 0x3af   : > { %v953_v22 = vsub.f32 %v934_v10, %v949_v21  ;;  %v950_v27 = vsub.f32 %v877_v9, %v940_v24 }
 0x3b1   : > { %v960_v23 = vmul.f32 1.442695, %v953_v22  ;;  %v954_v31 = vmul.f32 1.442695, %v950_v27 }
 0x3b2   : > { %v946_v25 = vpop.xlane.xlu1 %945 }
 0x3b3   : > { %v952_v26 = vsub.f32 %v915_v13, %v946_v25  ;;  %1673 = vpow2.f32 %v960_v23 }
 0x3b5   : > { %v958_v28 = vmul.f32 1.442695, %v952_v26 }
 0x3b6   : > { %v943_v29 = vpop.xlane.xlu2 %942 }
 0x3b7   : > { %1675 = vpow2.f32 %v958_v28  ;;  %v951_v30 = vsub.f32 %v896_v16, %v943_v29 }
 0x3b9   : > { %v956_v32 = vmul.f32 1.442695, %v951_v30  ;;  %v2013_v33 = vpop.eup %1673 }
 0x3ba   : > { %v971_v35 = vsel %vm861_vm6, %v2013_v33, 0.0 }
 0x3bb   : > { %1677 = vpow2.f32 %v956_v32  ;;  %972 = vadd.xlane.f32.xlu2 %v971_v35 }
 0x3bc   : > { %1679 = vpow2.f32 %v954_v31 }
 0x3bd   : > { %v2017_v38 = vpop.eup %1675 }
 0x3be   : > { %v968_v34 = vsel %vm861_vm6, %v2017_v38, 0.0  ;;  %v1659_v40 = vpop.permute.xlu2 %1658 }
 0x3bf   : > { %969 = vadd.xlane.f32.xlu0 %v968_v34  ;;  %v1661_v42 = vunpack.i.h.bf16 %v1659_v40  ;;  %v1660_v43 = vunpack.i.l.bf16 %v1659_v40 }
 0x3c1   : > { %v2021_v36 = vpop.eup %1677  ;;  %v759_v46 = vrot.slane %v1661_v42, 4  ;;  %v747_v47 = vrot.slane %v1660_v43, 4 }
 0x3c2   : > { %v965_v37 = vsel %vm861_vm6, %v2021_v36, 0.0  ;;  %v2025_v39 = vpop.eup %1679 }
 0x3c3   : > { %966 = vadd.xlane.f32.xlu1 %v965_v37  ;;  %v962_v41 = vsel %vm861_vm6, %v2025_v39, 0.0 }
 0x3c7   : > { %963 = vadd.xlane.f32.xlu0 %v962_v41 }
 0x3ca   : > { %v1654_v44 = vpop.permute.xlu1 %1653 }
 0x3cb   : > { %v1656_v48 = vunpack.i.h.bf16 %v1654_v44  ;;  %v1655_v49 = vunpack.i.l.bf16 %v1654_v44 }
 0x3cd   : > { %v761_v50 = vrot.slane %v1656_v48, 4  ;;  %v748_v51 = vsel %vm495_vm5, %v747_v47, %v1655_v49  ;;  %v749_v52 = vrot.slane %v1655_v49, 4  ;;  %v760_v53 = vsel %vm495_vm5, %v759_v46, %v1656_v48 }
 0x3ce   : > { %v754_v54 = vperm.slane %v748_v51, %v1917_v45  ;;  %v766_v55 = vperm.slane %v760_v53, %v1917_v45 }
 0x3cf   : > { %v750_v56 = vsel %vm495_vm5, %v1660_v43, %v749_v52  ;;  %v762_v57 = vsel %vm495_vm5, %v1661_v42, %v761_v50 }
 0x3d0   : > { %v758_v58 = vperm.slane %v750_v56, %v1917_v45  ;;  %v770_v59 = vperm.slane %v762_v57, %v1917_v45  ;;  %v771_v61 = vrot.slane %v766_v55, 4  ;;  %v773_v62 = vrot.slane %v754_v54, 4 }
 0x3d2   : > { %v772_v63 = vsel %vm495_vm5, %v771_v61, %v754_v54  ;;  %v774_v1 = vsel %vm495_vm5, %v766_v55, %v773_v62  ;;  %v783_v2 = vrot.slane %v770_v59, 4  ;;  %v785_v3 = vrot.slane %v758_v58, 4 }
 0x3d3   : > { %v778_v4 = vperm.slane %v772_v63, %v1927_v60  ;;  %v782_v5 = vperm.slane %v774_v1, %v1927_v60 }
 0x3d4   : > { %v784_v6 = vsel %vm495_vm5, %v783_v2, %v758_v58  ;;  %v786_v7 = vsel %vm495_vm5, %v770_v59, %v785_v3 }
 0x3d5   : > { %v790_v9 = vperm.slane %v784_v6, %v1927_v60  ;;  %v794_v10 = vperm.slane %v786_v7, %v1927_v60  ;;  %v795_v11 = vrot.slane %v778_v4, 4  ;;  %v797_v12 = vrot.slane %v782_v5, 4 }
 0x3d7   : > { %v798_v13 = vsel %vm495_vm5, 0.0, %v797_v12  ;;  %v799_v14 = vrot.slane %v790_v9, 4  ;;  %v801_v15 = vrot.slane %v794_v10, 4  ;;  %v803_v16 = vsel %vm495_vm5, %v797_v12, %v778_v4 }
 0x3d8   : > { %v808_v17 = vrot.slane %v798_v13, 4  ;;  %v796_v18 = vsel %vm495_vm5, 0.0, %v795_v11  ;;  %v807_v20 = vperm.slane %v803_v16, %v1917_v45 }
 0x3d9   : > { %v802_v19 = vsel %vm495_vm5, 0.0, %v801_v15  ;;  %v814_v21 = vsel %vm495_vm5, %v801_v15, %v790_v9  ;;  %v800_v25 = vsel %vm495_vm5, 0.0, %v799_v14 }
 0x3da   : > { %v819_v22 = vrot.slane %v802_v19, 4  ;;  %v809_v23 = vsel %vm495_vm5, %v808_v17, %v796_v18  ;;  %v818_v24 = vperm.slane %v814_v21, %v1917_v45  ;;  %v827_v27 = vrot.slane %v807_v20, 4 }
 0x3db   : > { %v813_v26 = vperm.slane %v809_v23, %v1917_v45 }
 0x3dc   : > { %v820_v28 = vsel %vm495_vm5, %v819_v22, %v800_v25  ;;  %v839_v29 = vrot.slane %v818_v24, 4 }
 0x3dd   : > { %v824_v30 = vperm.slane %v820_v28, %v1917_v45  ;;  %v828_v31 = vsel %vm495_vm5, %v813_v26, %v827_v27  ;;  %v825_v32 = vrot.slane %v813_v26, 4 }
 0x3de   : > { %v836_v35 = vperm.slane %v828_v31, %v1927_v60 }
 0x3df   : > { %v840_v34 = vsel %vm495_vm5, %v824_v30, %v839_v29  ;;  %v826_v37 = vsel %vm495_vm5, %v825_v32, %v807_v20  ;;  %v837_v40 = vrot.slane %v824_v30, 4 }
 0x3e0   : > { %v848_v41 = vperm.slane %v840_v34, %v1927_v60  ;;  %v855_v42 = vrot.slane %v836_v35, 4  ;;  %v832_v43 = vperm.slane %v826_v37, %v1927_v60 }
 0x3e1   : > { %v838_v44 = vsel %vm495_vm5, %v837_v40, %v818_v24 }
 0x3e2   : > { %v856_v46 = vsel %vm495_vm5, %v848_v41, %v855_v42  ;;  %v844_v47 = vperm.slane %v838_v44, %v1927_v60  ;;  %v851_v48 = vrot.slane %v832_v43, 4  ;;  %v853_v49 = vrot.slane %v848_v41, 4 }
 0x3e3   : > { %v860_v50 = vpack.c.bf16 %v856_v46, %v856_v46 }
 0x3e4   : > { %v852_v51 = vsel %vm495_vm5, %v844_v47, %v851_v48  ;;  %v854_v52 = vsel %vm495_vm5, %v853_v49, %v836_v35  ;;  %v849_v53 = vrot.slane %v844_v47, 4 }
 0x3e5   : > { %v1048_v54 = vsel %vm989_vm7, %v860_v50, 0  ;;  %v858_v55 = vpack.c.bf16 %v852_v51, %v852_v51  ;;  %v859_v56 = vpack.c.bf16 %v854_v52, %v854_v52 }
 0x3e6   : > { %1057 = vmatpush.bf16.msra.mxu0 %v1048_v54  ;;  %v850_v57 = vsel %vm495_vm5, %v849_v53, %v832_v43 }
 0x3e7   : > { %v1010_v58 = vsel %vm989_vm7, %v858_v55, 0  ;;  %v1029_v59 = vsel %vm989_vm7, %v859_v56, 0  ;;  %v857_v61 = vpack.c.bf16 %v850_v57, %v850_v57 }
 0x3e8   : > { %1019 = vmatpush.bf16.msrb.mxu2 %v1010_v58  ;;  %1038 = vmatpush.bf16.msrb.mxu3 %v1029_v59 }
 0x3e9   : > { %v991_v62 = vsel %vm989_vm7, %v857_v61, 0 }
 0x3ea   : > { %1000 = vmatpush.bf16.msrb.mxu1 %v991_v62 }
 0x42e   : > { %v973_v63 = vpop.xlane.xlu2 %972 }
 0x42f   : > { %1681 = vrcp.f32 %v973_v63 }
 0x432   : > { %v970_v1 = vpop.xlane.xlu0 %969 }
 0x433   : > { %1683 = vrcp.f32 %v970_v1 }
 0x435   : > { %v1682_v2 = vpop.eup %1681 }
 0x436   : > { %v967_v3 = vpop.xlane.xlu1 %966  ;;  %v981_v4 = vmul.f32 %v1682_v2, %v2013_v33 }
 0x437   : > { %1685 = vrcp.f32 %v967_v3 }
 0x438   : > { %v985_v6 = vpack.c.bf16 %v981_v4, %v981_v4 }
 0x439   : > { %v1684_v5 = vpop.eup %1683 }
 0x43a   : > { %v980_v7 = vmul.f32 %v1684_v5, %v2017_v38  ;;  %v964_v9 = vpop.xlane.xlu0 %963  ;;  %1522 = vmatmul.msk.bf16.vlgmr.msra.gmra.mxu0 %vm861_vm6, %v985_v6 }
 0x43b   : > { %1687 = vrcp.f32 %v964_v9 }
 0x43c   : > { %v984_v10 = vpack.c.bf16 %v980_v7, %v980_v7 }
 0x43d   : > { %v1686_v11 = vpop.eup %1685 }
 0x43e   : > { %v979_v12 = vmul.f32 %v1686_v11, %v2021_v36  ;;  %1521 = vmatmul.msk.bf16.vlgmr.msrb.gmra.mxu3 %vm861_vm6, %v984_v10 }
 0x440   : > { %v983_v13 = vpack.c.bf16 %v979_v12, %v979_v12 }
 0x441   : > { %v1688_v14 = vpop.eup %1687 }
 0x442   : > { %v978_v15 = vmul.f32 %v1688_v14, %v2025_v39  ;;  %1520 = vmatmul.msk.bf16.vlgmr.msrb.gmra.mxu2 %vm861_vm6, %v983_v13 }
 0x444   : > { %v982_v33 = vpack.c.bf16 %v978_v15, %v978_v15 }
 0x446   : > { %1519 = vmatmul.msk.bf16.vlgmr.msrb.gmra.mxu1 %vm861_vm6, %v982_v33 }
 0x4b7   : > { %v1059_v38 = vpop.f32.mrf.mxu0 }
 0x4b8   : > { %v1075_v20 = vrot.slane %v1059_v38, 4 }
 0x4bf   : > { %v1061_v16 = vpop.f32.mrf.mxu0 }
 0x4c1   : > { %v1040_v17 = vpop.f32.mrf.mxu3 }
 0x4c2   : > { %v1063_v18 = vrot.slane %v1040_v17, 4 }
 0x4c3   : > { %v1002_v19 = vpop.f32.mrf.mxu1 }
 0x4c4   : > { %v1064_v21 = vsel %vm495_vm5, %v1063_v18, %v1002_v19  ;;  %v1065_v36 = vrot.slane %v1002_v19, 4 }
 0x4c5   : > { %v1070_v22 = vperm.slane %v1064_v21, %v1917_v45  ;;  %v1021_v23 = vpop.f32.mrf.mxu2 }
 0x4c6   : > { %v1066_v24 = vsel %vm495_vm5, %v1040_v17, %v1065_v36  ;;  %v1076_v39 = vsel %vm495_vm5, %v1075_v20, %v1021_v23  ;;  %v1077_v25 = vrot.slane %v1021_v23, 4  ;;  %v1581_v23 = vld [vmem:[%s2222_s4 + $0x8] sm:$0xff] }
 0x4c7   : > { %v1074_v26 = vperm.slane %v1066_v24, %v1917_v45  ;;  %v1089_v27 = vrot.slane %v1070_v22, 4  ;;  %v1082_v28 = vperm.slane %v1076_v39, %v1917_v45  ;;  %1220 = vmatpush.bf16.msra.mxu1 %v1581_v23  ;;  %v1580_v24 = vld [vmem:[%s2222_s4] sm:$0xff] }
 0x4c8   : > { %v1078_v29 = vsel %vm495_vm5, %v1059_v38, %v1077_v25 }
 0x4c9   : > { %v1101_v30 = vrot.slane %v1074_v26, 4  ;;  %v1086_v31 = vperm.slane %v1078_v29, %v1917_v45  ;;  %v1087_v32 = vrot.slane %v1082_v28, 4  ;;  %v1090_v35 = vsel %vm495_vm5, %v1082_v28, %v1089_v27  ;;  %v1042_v34 = vpop.f32.mrf.mxu3 }
 0x4ca   : > { %v1098_v37 = vperm.slane %v1090_v35, %v1927_v60 }
 0x4cb   : > { %v1088_v40 = vsel %vm495_vm5, %v1087_v32, %v1070_v22  ;;  %v1099_v41 = vrot.slane %v1086_v31, 4  ;;  %v1102_v42 = vsel %vm495_vm5, %v1086_v31, %v1101_v30  ;;  %v1004_v43 = vpop.f32.mrf.mxu1  ;;  %1221 = vmatpush.bf16.msra.mxu1 %v1580_v24  ;;  %v1664_v30 = vld [vmem:[%s2223_s5] ss:$0 sm:$0xff] }
 0x4cc   : > { %v1094_v44 = vperm.slane %v1088_v40, %v1927_v60  ;;  %v1110_v46 = vperm.slane %v1102_v42, %v1927_v60  ;;  %v1113_v47 = vrot.slane %v1098_v37, 4 }
 0x4cd   : > { %v1100_v48 = vsel %vm495_vm5, %v1099_v41, %v1074_v26  ;;  %v1023_v49 = vpop.f32.mrf.mxu2 }
 0x4ce   : > { %v1106_v50 = vperm.slane %v1100_v48, %v1927_v60  ;;  %v1111_v51 = vrot.slane %v1094_v44, 4  ;;  %v1114_v52 = vsel %vm495_vm5, 0.0, %v1113_v47  ;;  %v1117_v53 = vrot.slane %v1110_v46, 4  ;;  %v1583_v46 = vld [vmem:[%s2226_s8 + $0x8] sm:$0xff] }
 0x4cf   : > { %v1124_v54 = vrot.slane %v1114_v52, 4  ;;  %v1119_v58 = vsel %vm495_vm5, %v1113_v47, %v1094_v44  ;;  %1290 = vmatpush.bf16.msra.mxu2 %v1583_v46 }
 0x4d0   : > { %v1112_v55 = vsel %vm495_vm5, 0.0, %v1111_v51  ;;  %v1115_v56 = vrot.slane %v1106_v50, 4  ;;  %v1118_v57 = vsel %vm495_vm5, 0.0, %v1117_v53  ;;  %v1130_v62 = vsel %vm495_vm5, %v1117_v53, %v1106_v50 }
 0x4d1   : > { %v1125_v59 = vsel %vm495_vm5, %v1124_v54, %v1112_v55  ;;  %v1135_v61 = vrot.slane %v1118_v57, 4  ;;  %v1134_v2 = vperm.slane %v1130_v62, %v1917_v45  ;;  %v1123_v4 = vperm.slane %v1119_v58, %v1917_v45 }
 0x4d2   : > { %v1116_v63 = vsel %vm495_vm5, 0.0, %v1115_v56  ;;  %v1129_v1 = vperm.slane %v1125_v59, %v1917_v45  ;;  %v1665_v56 = vld [vmem:[%s2224_s6] ss:$0 sm:$0xff] }
 0x4d3   : > { %v1136_v3 = vsel %vm495_vm5, %v1135_v61, %v1116_v63  ;;  %v1155_v7 = vrot.slane %v1134_v2, 4  ;;  %v1143_v33 = vrot.slane %v1123_v4, 4  ;;  %v1591_v63 = vld [vmem:[%s2228_s10 + $0x38] sm:$0xff] }
 0x4d4   : > { %v1140_v5 = vperm.slane %v1136_v3, %v1917_v45  ;;  %v1141_v6 = vrot.slane %v1129_v1, 4  ;;  %1410 = vmatpush.bf16.msra.mxu3 %v1591_v63 }
 0x4d5   : > { %v1144_v18 = vsel %vm495_vm5, %v1129_v1, %v1143_v33  ;;  %v1590_v1 = vld [vmem:[%s2228_s10 + $0x30] sm:$0xff] }
 0x4d6   : > { %v1142_v9 = vsel %vm495_vm5, %v1141_v6, %v1123_v4  ;;  %v1153_v10 = vrot.slane %v1140_v5, 4  ;;  %v1156_v13 = vsel %vm495_vm5, %v1140_v5, %v1155_v7  ;;  %v1152_v20 = vperm.slane %v1144_v18, %v1927_v60  ;;  %v1589_v4 = vld [vmem:[%s2228_s10 + $0x28] sm:$0xff]  ;;  %v1588_v7 = vld [vmem:[%s2228_s10 + $0x20] sm:$0xff] }
 0x4d7   : > { %v1148_v11 = vperm.slane %v1142_v9, %v1927_v60  ;;  %v1164_v45 = vperm.slane %v1156_v13, %v1927_v60 }
 0x4d8   : > { %v1154_v12 = vsel %vm495_vm5, %v1153_v10, %v1134_v2  ;;  %v1171_v36 = vrot.slane %v1152_v20, 4  ;;  %v1667_v2 = vld [vmem:[%s2227_s9] ss:$0 sm:$0xff]  ;;  %1411 = vmatpush.bf16.msra.mxu3 %v1590_v1 }
 0x4d9   : > { %v1160_v14 = vperm.slane %v1154_v12, %v1927_v60  ;;  %v1167_v15 = vrot.slane %v1148_v11, 4  ;;  %v1169_v19 = vrot.slane %v1164_v45, 4  ;;  %v1587_v12 = vld [vmem:[%s2228_s10 + $0x18] sm:$0xff] }
 0x4da   : > { %v1172_v22 = vsel %vm495_vm5, %v1164_v45, %v1171_v36 }
 0x4db   : > { %v1165_v38 = vrot.slane %v1160_v14, 4  ;;  %v1168_v16 = vsel %vm495_vm5, %v1160_v14, %v1167_v15  ;;  %v1170_v21 = vsel %vm495_vm5, %v1169_v19, %v1152_v20  ;;  %v1585_v19 = vld [vmem:[%s2228_s10 + $0x8] sm:$0xff] }
 0x4dc   : > { %1174 = vrot.lane.b32.xlu0 %v1168_v16, %s1765_s15  ;;  %1412 = vmatpush.bf16.msra.mxu3 %v1589_v4  ;;  %s1504_s15 = sshll.u32 %s402_s29, 3 }
 0x4dd   : > { %v1166_v17 = vsel %vm495_vm5, %v1165_v38, %v1148_v11  ;;  %v1586_v38 = vld [vmem:[%s2228_s10 + $0x10] sm:$0xff]  ;;  %s404_s28 = scalar_lea.vmem [#allocation2], %s1504_s15  ;;  %s1713_s15 = scalar_lea.hbm %s2230_s12, 16 }
 0x4de   : > { %s1438_s0 = sshll.u32 %s404_s28, 4  ;;  %s1439_s0 = int_to_ptr.vmem [resolvable:$true] %s1438_s0 }
 0x4e0   : > { %1413 = vmatpush.bf16.msra.mxu3 %v1588_v7 }
 0x4e4   : > { %1178 = vrot.lane.b32.xlu0 %v1170_v21, %s1766_s16  ;;  %1414 = vmatpush.bf16.msra.mxu3 %v1587_v12  ;;  %s1575_s16 = sshll.u32 %s1854_s25, 3  ;;  %s1426_s25 = scalar_lea.sflag [#allocation3], %s402_s29 }
 0x4e5   : > { %s1436_s26 = scalar_lea.hbm %s2230_s12, %s1575_s16 }
 0x4e6   : > { %s1440_s1 = sshll.u32 %s1436_s26, 4  ;;  %s1441_s1 = int_to_ptr.hbm [resolvable:$true] %s1440_s1 }
 0x4e7   : > { %s1707_s2 = sshra.s32 %s1441_s1, 4  ;;  %s1708_s2 = int_to_ptr.hbm [resolvable:$true] %s1707_s2 }
 0x4e8   : > { %1415 = vmatpush.bf16.msra.mxu3 %v1586_v38  ;;  %p1714_p0 = scmp.lt.s32.totalorder %s1708_s2, %s2230_s12 }
 0x4ec   : > { %1182 = vrot.lane.b32.xlu0 %v1172_v22, %s1767_s17  ;;  %1416 = vmatpush.bf16.msra.mxu3 %v1585_v19  ;;  %v1584_v22 = vld [vmem:[%s2228_s10] sm:$0xff]  ;;  %s1709_s17 = scalar_lea.hbm %s1708_s2, 8 }
 0x4ed   : > { %p1710_p11 = scmp.ne.s32.totalorder %s1708_s2, %s1709_s17  ;;  %p1715_p1 = scmp.lt.s32.totalorder %s1713_s15, %s1709_s17 }
 0x4ef   : > { %p1711_p12 = pnand %p1710_p11, %p1871_p5  ;;  %p1716_p2 = por %p1715_p1, %p1714_p0 }
 0x4f0   : > { %1417 = vmatpush.bf16.msra.mxu3 %v1584_v22 }
 0x4f1   : > { %p1712_p13 = pneg %p1711_p12 }
 0x4f3   : > { %p1717_p3 = pnand %p1716_p2, %p1712_p13 }
 0x54e   : > { %v1175_v60 = vpop.permute.xlu0 %1174 }
 0x54f   : > { %v1185_v25 = vsel %vm861_vm6, %v1166_v17, %v1175_v60 }
 0x556   : > { %v1179_v39 = vpop.permute.xlu0 %1178 }
 0x557   : > { %v1187_v26 = vsel %vm1186_vm8, %v1185_v25, %v1179_v39 }
 0x55e   : > { %v1183_v27 = vpop.permute.xlu0 %1182 }
 0x55f   : > { %v1189_v28 = vsel %vm1188_vm9, %v1187_v26, %v1183_v27 }
 0x560   : > { %v1190_v29 = vpack.c.bf16 %v1189_v28, %v1189_v28 }
 0x562   : > { %1531 = vmatmul.msk.bf16.vlgmr.msra.gmra.mxu1 %vm411_vm0, %v1190_v29 }
 0x5df   : > { %v1223_v31 = vpop.f32.mrf.mxu1 }
 0x5e0   : > { %v1224_v32 = vadd.f32 %v1664_v30, %v1223_v31 }
 0x5e2   : > { %v2133_v35 = vadd.f32 %v1224_v32, %v1886_v0  ;;  %v1582_v0 = vld [vmem:[%s2226_s8] sm:$0xff] }
 0x5e3   : > { %1291 = vmatpush.bf16.msra.mxu2 %v1582_v0 }
 0x5e4   : > { %v1228_v34 = vsel %vm411_vm0, %v2133_v35, 0.0 }
 0x5e5   : > { %1229 = vadd.xlane.f32.xlu1 %v1228_v34 }
 0x5e7   : > { %v1225_v37 = vpop.f32.mrf.mxu1 }
 0x658   : > { %v1230_v40 = vpop.xlane.xlu1 %1229 }
 0x659   : > { %v1231_v41 = vmul.f32 %v1230_v40, %v1890_v8 }
 0x65b   : > { %v1232_v42 = vsub.f32 %v2133_v35, %v1231_v41 }
 0x65d   : > { %v1233_v43 = vmul.f32 %v1232_v42, %v1232_v42 }
 0x65f   : > { %v1234_v44 = vsel %vm411_vm0, %v1233_v43, 0.0 }
 0x660   : > { %1235 = vadd.xlane.f32.xlu0 %v1234_v44 }
 0x6d3   : > { %v1236_v47 = vpop.xlane.xlu0 %1235 }
 0x6d4   : > { %v1237_v48 = vmul.f32 %v1236_v47, %v1890_v8  ;;  %v1666_v8 = vld [vmem:[%s2225_s7] ss:$0 sm:$0xff] }
 0x6d6   : > { %v1238_v49 = vadd.f32 1e-05, %v1237_v48 }
 0x6d8   : > { %1689 = vrsqrt.f32 %v1238_v49  ;;  %vm1245_vm11 = vweird.f32 %v1238_v49 }
 0x6de   : > { %v1690_v50 = vpop.eup %1689 }
 0x6df   : > { %v1240_v51 = vmul.f32 %v1690_v50, %v1238_v49  ;;  %vm1246_vm10 = vweird.f32 %v1690_v50 }
 0x6e0   : > { %vm1247_vm12 = vmor %vm1245_vm11, %vm1246_vm10 }
 0x6e1   : > { %v1241_v52 = vmul.f32 %v1690_v50, %v1240_v51 }
 0x6e3   : > { %v1242_v53 = vmul.f32 0.5, %v1241_v52  ;;  %v1668_v52 = vld [vmem:[%s2229_s11] ss:$0 sm:$0xff] }
 0x6e5   : > { %v1243_v54 = vsub.f32 1.5, %v1242_v53 }
 0x6e7   : > { %v1244_v55 = vmul.f32 %v1690_v50, %v1243_v54 }
 0x6e9   : > { %v1248_v57 = vsel %vm1247_vm12, %v1690_v50, %v1244_v55 }
 0x6ea   : > { %v1249_v58 = vmul.f32 %v1248_v57, %v1232_v42 }
 0x6ec   : > { %v1254_v59 = vmul.f32 %v1665_v56, %v1249_v58 }
 0x6ee   : > { %v1259_v61 = vadd.f32 %v1666_v8, %v1254_v59 }
 0x6f0   : > { %v1260_v62 = vpack.c.bf16 %v1259_v61, %v1259_v61 }
 0x6f2   : > { %1540 = vmatmul.msk.bf16.vlgmr.msra.gmra.mxu2 %vm411_vm0, %v1260_v62 }
 0x775   : > { %v1293_v3 = vpop.f32.mrf.mxu2 }
 0x776   : > { %v1294_v5 = vadd.f32 %v1667_v2, %v1293_v3 }
 0x778   : > { %v1298_v6 = vmul.f32 0.70710677, %v1294_v5  ;;  %v1297_v48 = vmul.f32 0.5, %v1294_v5 }
 0x77a   : > { %v1299_v9 = vmul.f32 %v1298_v6, %v1298_v6 }
 0x77c   : > { %v1300_v10 = vmin.f32 %v1299_v9, 16.0 }
 0x77d   : > { %v1295_v11 = vpop.f32.mrf.mxu2 }
 0x77e   : > { %v1301_v13 = vmul.f32 2.1237322e-06, %v1300_v10  ;;  %v1312_v14 = vmul.f32 3.8918573e-05, %v1300_v10 }
 0x780   : > { %v1302_v15 = vadd.f32 0.00028619796, %v1301_v13  ;;  %v1313_v33 = vadd.f32 0.001143296, %v1312_v14 }
 0x782   : > { %v1303_v16 = vmul.f32 %v1302_v15, %v1300_v10  ;;  %v1314_v45 = vmul.f32 %v1313_v33, %v1300_v10 }
 0x784   : > { %v1315_v17 = vadd.f32 0.014752088, %v1314_v45  ;;  %v1304_v18 = vadd.f32 0.0036580483, %v1303_v16 }
 0x786   : > { %v1316_v20 = vmul.f32 %v1315_v17, %v1300_v10  ;;  %v1305_v36 = vmul.f32 %v1304_v18, %v1300_v10 }
 0x788   : > { %v1317_v21 = vadd.f32 0.112945676, %v1316_v20  ;;  %v1306_v60 = vadd.f32 0.05243302, %v1305_v36 }
 0x78a   : > { %v1318_v23 = vmul.f32 %v1317_v21, %v1300_v10  ;;  %v1307_v26 = vmul.f32 %v1306_v60, %v1300_v10 }
 0x78c   : > { %v1319_v24 = vadd.f32 0.4994258, %v1318_v23  ;;  %v1308_v27 = vadd.f32 0.18741608, %v1307_v26 }
 0x78e   : > { %v1320_v39 = vmul.f32 %v1319_v24, %v1300_v10  ;;  %v1309_v29 = vmul.f32 %v1308_v27, %v1300_v10 }
 0x790   : > { %v1321_v25 = vadd.f32 1.0, %v1320_v39  ;;  %v1310_v34 = vadd.f32 1.1283791, %v1309_v29 }
 0x792   : > { %1691 = vrcp.f32 %v1321_v25  ;;  %v1333_v32 = vand.u32 2147483648, %v1321_v25  ;;  %v1331_v40 = vand.u32 2147483647, %v1321_v25  ;;  %vm1327_vm14 = vweird.f32 %v1321_v25 }
 0x793   : > { %v1311_v43 = vmul.f32 %v1310_v34, %v1298_v6 }
 0x794   : > { %v1334_v42 = vor.u32 1.1754944e-38, %v1333_v32  ;;  %vm1332_vm1 = vcmp.eq.f32.partialorder %v1331_v40, 8.507059e+37 }
 0x798   : > { %v1692_v28 = vpop.eup %1691 }
 0x799   : > { %v1323_v30 = vmul.f32 %v1692_v28, %v1321_v25  ;;  %vm1328_vm13 = vweird.f32 %v1692_v28 }
 0x79a   : > { %vm1329_vm15 = vmor %vm1327_vm14, %vm1328_vm13 }
 0x79b   : > { %v1324_v31 = vsub.f32 1.0, %v1323_v30 }
 0x79d   : > { %v1325_v37 = vmul.f32 %v1692_v28, %v1324_v31 }
 0x79f   : > { %v1326_v41 = vadd.f32 %v1692_v28, %v1325_v37 }
 0x7a1   : > { %v1330_v44 = vsel %vm1329_vm15, %v1692_v28, %v1326_v41 }
 0x7a2   : > { %v1335_v46 = vsel %vm1332_vm1, %v1334_v42, %v1330_v44 }
 0x7a3   : > { %v1336_v0 = vmul.f32 %v1335_v46, %v1311_v43 }
 0x7a5   : > { %v1541_v47 = vclamps-f32 %v1336_v0, 1.0 }
 0x7a7   : > { %v1339_v49 = vadd.f32 1.0, %v1541_v47 }
 0x7a9   : > { %v1340_v50 = vmul.f32 %v1339_v49, %v1297_v48 }
 0x7ab   : > { %v1341_v51 = vpack.c.bf16 %v1340_v50, %v1340_v50 }
 0x7ad   : > { %1418 = vmatmul.bf16.vlgmr.msra.gmra.mxu3 %v1341_v51 }
 0x830   : > { %v1419_v53 = vpop.f32.mrf.mxu3 }
 0x831   : > { %v1420_v54 = vadd.f32 %v1668_v52, %v1419_v53 }
 0x833   : > { %v1423_v55 = vadd.f32 %v1420_v54, %v2133_v35 }
 0x835   : > { %1424 = vst.msk [vmem:[%s404_s28] sm:$0xff] %vm411_vm0, %v1423_v55 }
 0x836   : > { %1720 = shalt.err (!%p1717_p3)
}
 0x837   : > { %1592 = dma.vmem_to_hbm [thread:$0]  (%p1871_p5), %s1439_s0, 128, %s1441_s1, %s1426_s25  }
 0x838   : > { %v1421_v35 = vpop.f32.mrf.mxu3 }
 0x839 PF: > { %p1598_p4 = scmp.ge.s32.totalorder %s1755_s24, 2  ;;  %s1452_s29 = sand.u32 1, %s1743_s21  }
 0x83a   : > { %s1453_s26 = scalar_lea.sflag [#allocation3], %s1452_s29 }
 0x83b   : > { %p1595_p7 = pnand %p1598_p4, %p1875_p6 }
 0x83d   : > { %p1596_p8 = pneg %p1595_p7 }
 0x83f   : > { %1738 = dma.done.wait (%p1596_p8), %s1453_s26, 128  }
 0x840   : > { %1740 = vsyncadd (%p1596_p8), %s1453_s26, 4294967168  ;;  %p22_p9 = scmp.ge.s32.totalorder %s1858_s27, 4   ;;  %s2239_s21 = smov %s1747_s22 }
 0x841   : > { %s2240_s22 = smov %s1751_s23  ;;  %s2241_s23 = smov %s1869_s30 }
 0x842   : > { %s2242_s24 = smov %s1858_s27  ;;  %24 = sbr.rel (!%p22_p9) target bundleno = 7 (0x7), region = 103 }
 0x847   :  { %1459 = vsyncpa [#allocation3], 1 }
 0x848   :  { %1461 = vsyncpa [#allocation3 + $0x1], 1 }

</bundles_post_ra>
